<compile_context>
chip_gen: v6e
topology: v6e:2x2x1
jax: 0.10.0
libtpu: 0.0.40
codegen_flags: <defaults>
</compile_context>

<pallas_src>
from functools import partial

import jax
import jax.numpy as jnp
from jax import lax
from jax.experimental import pallas as pl
from jax.experimental.pallas import tpu as pltpu

# ----------------------------- config (synthetic) -----------------------------
INPUT_DIM = 8            # input feature dim (even: GLU halves the conv0 channels)
HIDDEN = 32              # config.asr_adapter_hidden_size
INTERMEDIATE = 64        # config.asr_adapter_intermediate_size
RMS_EPS = 1e-6           # config.rms_norm_eps
# config.hidden_act == "silu", config.mlp_bias == False, config.pretraining_tp == 1
# (tp > 1 branch is mathematically identical).


def _round_up(x, m):
    return ((x + m - 1) // m) * m


# ------------------------------ fused kernel body ------------------------------
def _asr_adapter_kernel(xg_ref, xgs_ref, h1p_ref,
                        w0e_ref, w0o1_ref, w0o2_ref, b0_ref,
                        w1t0_ref, w1t1_ref, w1t2_ref, b1_ref,
                        wgu_ref, wd_ref, rmsw_ref, wp_ref, bp_ref,
                        o_ref, *, eps, cdt):
    def dot(a, w_ref):
        # MXU path: bf16 (or f32) operands, f32 accumulation.
        return jnp.dot(a.astype(cdt), w_ref[...], preferred_element_type=jnp.float32)

    def glu(y):
        c = y.shape[-1] // 2
        return y[:, :c] * jax.nn.sigmoid(y[:, c:])

    xa = xg_ref[...]        # xg[t0 + j]      (TB, 4*Cin)  f32
    xb = xgs_ref[...]       # xg[t0 + j + 1]  (TB, 4*Cin)  f32 (pre-shifted operand)

    # ---- conv0 (k=3, stride 2, pad 1) + GLU, phase-decomposed over stride-4 groups ----
    h1e = glu(dot(xa, w0e_ref) + b0_ref[...])                            # h1g[2t]   (TB, C0/2)
    h1o = glu(dot(xa, w0o1_ref) + dot(xb, w0o2_ref) + b0_ref[...])       # h1g[2t+1] (TB, C0/2)

    # h1g[2t-1]: roll the odd rows down by one (XLU) and patch row 0 with the
    # precomputed previous-tile halo (structural zero for the very first tile).
    rolled = pltpu.roll(h1o, shift=1, axis=0)
    row = lax.broadcasted_iota(jnp.int32, h1o.shape, 0)
    h1o_m1 = jnp.where(row == 0, h1p_ref[...], rolled)

    # ---- conv1 (k=3, stride 2, pad 1) + GLU  ->  subsampler output (residual) ----
    h2 = glu(dot(h1o_m1, w1t0_ref) + dot(h1e, w1t1_ref) + dot(h1o, w1t2_ref)
             + b1_ref[...])                                              # (TB, H)

    # ---- ASRAdapterMLP: down(silu(gate(x)) * up(x)), gate/up fused into ONE dot ----
    gu = dot(h2, wgu_ref)                                                # (TB, 2*I)
    i = gu.shape[-1] // 2
    g, u = gu[:, :i], gu[:, i:]
    mlp = dot((g * jax.nn.sigmoid(g)) * u, wd_ref)                       # (TB, H)

    # ---- LlamaRMSNorm + residual + projector (lane-dense padded output) ----
    var = jnp.mean(mlp * mlp, axis=-1, keepdims=True)
    normed = mlp * lax.rsqrt(var + eps) * rmsw_ref[...]
    res = h2 + normed
    o_ref[...] = (dot(res, wp_ref) + bp_ref[...]).astype(o_ref.dtype)


def _cost_estimate(batch, rows, cin, c0, hid, inter, hid_pad, weight_bytes):
    c0h = c0 // 2
    n = batch * rows
    macs = n * (3 * (4 * cin) * c0        # conv0: even (1 dot) + odd (2 dots), fused GLU
                + 3 * c0h * (2 * hid)     # conv1: 3 taps, fused GLU
                + hid * (2 * inter)       # fused gate+up
                + inter * hid             # down
                + hid * hid_pad)          # projector (lane-padded)
    trans = n * (c0 + hid + inter + 1)
    bytes_accessed = (4 * batch * (2 * rows + 1) * 4 * cin   # xg + shifted view
                      + 4 * n * hid_pad                      # output
                      + weight_bytes)
    return pl.CostEstimate(flops=int(2 * macs), transcendentals=int(trans),
                           bytes_accessed=int(bytes_accessed))


def _vmem_limit_bytes(tile_bytes, weight_bytes, weight_bufs):
    """Size the VMEM budget from the actual working set (not a hard-coded 32 MiB)."""
    try:
        phys = int(pltpu.get_tpu_info().vmem_capacity_bytes)
    except Exception:
        phys = 64 * 1024 * 1024          # conservative default: v7x per-core VMEM
    needed = int(1.3 * (tile_bytes + weight_bufs * weight_bytes)) + (8 << 20)
    cap = min(100 << 20, phys - (8 << 20))   # ~100 MiB on v5e/v6e, ~56 MiB on v7x
    return max(32 << 20, min(needed, cap))


# --------------------------------- forward pass ---------------------------------
def asr_adapter_forward(x, pp, *, tile_rows=512):
    """x: (B, T, input_dim) float32 with T % 4 == 0 -> (B, T // 4, hidden) float32."""
    B, T, cin = x.shape
    if T % 4 != 0:
        # TODO(synk): support T % 4 != 0 (needs masking of the conv edge pads).
        raise ValueError("in_seq_len must be a multiple of 4")
    c0 = pp["w0e"].shape[-1]
    c0h = c0 // 2
    hid = pp["wd"].shape[-1]
    inter2 = pp["wgu"].shape[-1]
    hid_pad = pp["wp"].shape[-1]
    cdt = pp["wp"].dtype
    t_out = T // 4                                   # 4x-subsampled sequence length

    TB = min(_round_up(tile_rows, 8), _round_up(t_out, 8))   # rows per grid step (mult of 8)
    n_tiles = pl.cdiv(t_out, TB)
    # v7x has 2 TensorCores: make sure there are >= 2 "parallel" grid steps when possible.
    while B * n_tiles < 2 and TB > 8:
        TB = max(8, _round_up(TB // 2, 8))
        n_tiles = pl.cdiv(t_out, TB)
    tp2 = n_tiles * TB                               # padded output rows

    # structural left pad (1) + right pad, then a FREE reshape into groups of 4 frames
    # -> (B, tp2 + 1, 4*Cin).
    xpp = jnp.pad(x, ((0, 0), (1, 4 * tp2 + 3 - T), (0, 0)))
    xg = xpp.reshape(B, tp2 + 1, 4 * cin)
    xgs = xg[:, 1:, :]                               # pre-shifted view: row t == xg[t + 1]

    # Per-tile halo: h1g[2*t0 - 1] (previous odd conv0+GLU row); structural zero for
    # tile 0 (conv1 left pad).  Tiny (B, n_tiles, 1, C0/2) precompute in plain JAX.
    zero_row = jnp.zeros((B, 1, c0h), jnp.float32)
    if n_tiles > 1:
        ga = xg[:, TB - 1:tp2 - 1:TB, :]             # groups i*TB - 1, i = 1..n_tiles-1
        gb = xg[:, TB:tp2:TB, :]                     # groups i*TB,     i = 1..n_tiles-1
        y = (ga @ pp["w0o1"].astype(jnp.float32)
             + gb @ pp["w0o2"].astype(jnp.float32) + pp["b0"])
        hprev = y[..., :c0h] * jax.nn.sigmoid(y[..., c0h:])
        h1o_prev = jnp.concatenate([zero_row, hprev], axis=1)
    else:
        h1o_prev = zero_row
    h1o_prev = h1o_prev[:, :, None, :]               # (B, n_tiles, 1, C0/2)

    weight_names = ("w0e", "w0o1", "w0o2", "b0", "w1t0", "w1t1", "w1t2", "b1",
                    "wgu", "wd", "rms_w", "wp", "bp")
    weights = [pp[k] for k in weight_names]
    weight_bytes = sum(int(w.size) * w.dtype.itemsize for w in weights)

    # Resident weights never change block index; once they are big enough that a second
    # pipeline buffer matters (v7x: 64 MiB VMEM), single-buffer them.
    single_buf_weights = weight_bytes > (8 << 20)
    weight_bufs = 1 if single_buf_weights else 2

    def _const_spec(a):
        nd = a.ndim
        idx = lambda b, t: (0,) * nd
        if single_buf_weights:
            return pl.BlockSpec(a.shape, idx, pipeline_mode=pl.Buffered(1))
        return pl.BlockSpec(a.shape, idx)

    tile_bytes = 2 * 4 * (2 * TB * 4 * cin           # xg + xgs tiles (double-buffered, f32)
                          + c0h                      # halo row
                          + TB * hid_pad)            # output tile (f32)

    out = pl.pallas_call(
        partial(_asr_adapter_kernel, eps=RMS_EPS, cdt=cdt),
        out_shape=jax.ShapeDtypeStruct((B, tp2, hid_pad), jnp.float32),
        grid=(B, n_tiles),
        in_specs=[
            pl.BlockSpec((None, TB, 4 * cin), lambda b, t: (b, t, 0)),        # xg[t0+j]
            pl.BlockSpec((None, TB, 4 * cin), lambda b, t: (b, t, 0)),        # xg[t0+j+1]
            pl.BlockSpec((None, None, 1, c0h), lambda b, t: (b, t, 0, 0)),    # prev odd row
        ] + [_const_spec(w) for w in weights],
        out_specs=pl.BlockSpec((None, TB, hid_pad), lambda b, t: (b, t, 0)),
        compiler_params=pltpu.CompilerParams(
            dimension_semantics=("parallel", "parallel"),
            vmem_limit_bytes=_vmem_limit_bytes(tile_bytes, weight_bytes, weight_bufs)),
        cost_estimate=_cost_estimate(B, tp2, cin, c0, hid, inter2 // 2, hid_pad,
                                     weight_bytes),
    )(xg, xgs, h1o_prev, *weights)

    # NOTE: rows >= t_out in the last tile come from zero-padded input (bias-only, nonzero)
    # and columns >= hid are projector lane padding; both are sliced off here and must
    # never be mixed into valid rows by future cross-row reductions.
    return out[:, :t_out, :hid]


# ------------------------------ parameters & prep ------------------------------
def init_params(key, input_dim=INPUT_DIM, hidden=HIDDEN, inter=INTERMEDIATE):
    """PyTorch-layout parameters of ASRAdapter (synthetic init)."""
    ks = jax.random.split(key, 9)
    s = 0.02

    def n(k, shape):
        return (s * jax.random.normal(k, shape)).astype(jnp.float32)

    return {
        # Conv1dSubsampler(input_dim, input_dim, hidden, [3, 3]):
        #   conv0: Conv1d(input_dim, input_dim, 3, stride=2, padding=1)
        #   conv1: Conv1d(input_dim // 2, 2 * hidden, 3, stride=2, padding=1)
        "conv0_w": n(ks[0], (input_dim, input_dim, 3)),
        "conv0_b": n(ks[1], (input_dim,)),
        "conv1_w": n(ks[2], (2 * hidden, input_dim // 2, 3)),
        "conv1_b": n(ks[3], (2 * hidden,)),
        # ASRAdapterMLP (bias=False); PyTorch Linear weight layout is (out, in)
        "gate_w": n(ks[4], (inter, hidden)),
        "up_w": n(ks[5], (inter, hidden)),
        "down_w": n(ks[6], (hidden, inter)),
        # LlamaRMSNorm weight init = ones
        "rms_w": jnp.ones((hidden,), jnp.float32),
        # projector: Linear(hidden, hidden) with bias
        "proj_w": n(ks[7], (hidden, hidden)),
        "proj_b": n(ks[8], (hidden,)),
    }


def prepare_params(p, compute_dtype=jnp.bfloat16):
    """One-time weight prep (hoisted out of the forward):
       * fold stride-2 conv taps onto the group-of-4 input layout,
       * keep GLU / gate+up halves FUSED in a single (K, 2*N) matrix per dot,
       * transpose Linear weights to (in, out), pad the projector to a lane-dense
         multiple of 128 output columns,
       * cast MXU weight operands to compute_dtype (biases / RMS weight stay f32)."""
    c0 = p["conv0_w"].shape[0]
    hid = p["proj_w"].shape[0]
    hid_pad = _round_up(hid, 128)
    cdt = compute_dtype

    w0 = [p["conv0_w"][:, :, k].T for k in range(3)]            # (Cin, C0) per tap
    z = jnp.zeros_like(w0[0])
    w0e = jnp.concatenate([w0[0], w0[1], w0[2], z], axis=0)     # even conv0 rows
    w0o1 = jnp.concatenate([z, z, w0[0], w0[1]], axis=0)        # odd rows (this group)
    w0o2 = jnp.concatenate([w0[2], z, z, z], axis=0)            # odd rows (next group)

    w1 = [p["conv1_w"][:, :, k].T for k in range(3)]            # (C0/2, 2*H) per tap
    wgu = jnp.concatenate([p["gate_w"].T, p["up_w"].T], axis=1) # fused (H, 2*I)

    wp = jnp.zeros((hid, hid_pad), jnp.float32).at[:, :hid].set(p["proj_w"].T)
    bp = jnp.zeros((1, hid_pad), jnp.float32).at[:, :hid].set(p["proj_b"])

    return {
        "w0e": w0e.astype(cdt), "w0o1": w0o1.astype(cdt), "w0o2": w0o2.astype(cdt),
        "b0": p["conv0_b"].reshape(1, c0).astype(jnp.float32),
        "w1t0": w1[0].astype(cdt), "w1t1": w1[1].astype(cdt), "w1t2": w1[2].astype(cdt),
        "b1": p["conv1_b"].reshape(1, 2 * hid).astype(jnp.float32),
        "wgu": wgu.astype(cdt), "wd": p["down_w"].T.astype(cdt),
        "rms_w": p["rms_w"].reshape(1, hid).astype(jnp.float32),
        "wp": wp.astype(cdt), "bp": bp,
    }


# ------------------------------- pure-JAX reference ----------------------------
def _ref_forward(x, p):
    def conv_glu(h, w, b):
        y = lax.conv_general_dilated(
            h, jnp.transpose(w, (2, 1, 0)),              # (K, Cin, Cout)
            window_strides=(2,), padding=((1, 1),),
            dimension_numbers=("NWC", "WIO", "NWC"))
        y = y + b[None, None, :]
        c = y.shape[-1] // 2
        return y[..., :c] * jax.nn.sigmoid(y[..., c:])

    h = conv_glu(x, p["conv0_w"], p["conv0_b"])
    h = conv_glu(h, p["conv1_w"], p["conv1_b"])
    g = h @ p["gate_w"].T
    u = h @ p["up_w"].T
    mlp = ((g * jax.nn.sigmoid(g)) * u) @ p["down_w"].T
    var = jnp.mean(mlp * mlp, axis=-1, keepdims=True)
    normed = mlp * lax.rsqrt(var + RMS_EPS) * p["rms_w"]
    res = h + normed
    return res @ p["proj_w"].T + p["proj_b"]


# ------------------------------------ main -------------------------------------
if __name__ == "__main__":
    key = jax.random.PRNGKey(0)
    kx, kp = jax.random.split(key)

    B, T = 2, 72        # T % 4 == 0; 72 frames -> 18 subsampled rows -> 3 tiles of 8 rows
    x = jax.random.normal(kx, (B, T, INPUT_DIM), dtype=jnp.float32)
    params = init_params(kp)
    prepped = prepare_params(params, compute_dtype=jnp.bfloat16)   # bf16 MXU operands

    fwd = jax.jit(partial(asr_adapter_forward, tile_rows=8))
    out = jax.block_until_ready(fwd(x, prepped))

    ref = _ref_forward(x, params)
    assert out.shape == ref.shape == (B, T // 4, HIDDEN), (out.shape, ref.shape)
    max_diff = float(jnp.max(jnp.abs(out - ref)))
    # bf16 MXU operands vs f32 reference -> loosened tolerance (f32 parity available via
    # prepare_params(..., compute_dtype=jnp.float32)).
    assert max_diff < 1e-3, "mismatch vs reference, max abs diff = %e" % max_diff

    print("KERNEL_OK")
</pallas_src>

<mosaic_0001>
module attributes {stable_mosaic.version = 11 : i64} {
  func.func @_asr_adapter_kernel(%arg0: i32, %arg1: i32, %arg2: memref<1x8x32xf32, #tpu.memory_space<vmem>>, %arg3: memref<1x8x32xf32, #tpu.memory_space<vmem>>, %arg4: memref<1x1x1x4xf32, #tpu.memory_space<vmem>>, %arg5: memref<32x8xbf16, #tpu.memory_space<vmem>>, %arg6: memref<32x8xbf16, #tpu.memory_space<vmem>>, %arg7: memref<32x8xbf16, #tpu.memory_space<vmem>>, %arg8: memref<1x8xf32, #tpu.memory_space<vmem>>, %arg9: memref<4x64xbf16, #tpu.memory_space<vmem>>, %arg10: memref<4x64xbf16, #tpu.memory_space<vmem>>, %arg11: memref<4x64xbf16, #tpu.memory_space<vmem>>, %arg12: memref<1x64xf32, #tpu.memory_space<vmem>>, %arg13: memref<32x128xbf16, #tpu.memory_space<vmem>>, %arg14: memref<64x32xbf16, #tpu.memory_space<vmem>>, %arg15: memref<1x32xf32, #tpu.memory_space<vmem>>, %arg16: memref<32x128xbf16, #tpu.memory_space<vmem>>, %arg17: memref<1x128xf32, #tpu.memory_space<vmem>>, %arg18: memref<1x8x128xf32, #tpu.memory_space<vmem>>) attributes {dimension_semantics = [#tpu.dimension_semantics<parallel>, #tpu.dimension_semantics<parallel>], iteration_bounds = array<i64: 2, 3>, scalar_prefetch = 0 : i64, scratch_operands = 0 : i64, tpu.core_type = #tpu.core_type<tc>, window_params = [{transform_indices = @transform_0, window_bounds = array<i64: 1, 8, 32>}, {transform_indices = @transform_1, window_bounds = array<i64: 1, 8, 32>}, {transform_indices = @transform_2, window_bounds = array<i64: 1, 1, 1, 4>}, {pipeline_mode = #tpu.pipeline_mode<synchronous>, transform_indices = @transform_3, window_bounds = array<i64: 32, 8>}, {pipeline_mode = #tpu.pipeline_mode<synchronous>, transform_indices = @transform_4, window_bounds = array<i64: 32, 8>}, {pipeline_mode = #tpu.pipeline_mode<synchronous>, transform_indices = @transform_5, window_bounds = array<i64: 32, 8>}, {pipeline_mode = #tpu.pipeline_mode<synchronous>, transform_indices = @transform_6, window_bounds = array<i64: 1, 8>}, {pipeline_mode = #tpu.pipeline_mode<synchronous>, transform_indices = @transform_7, window_bounds = array<i64: 4, 64>}, {pipeline_mode = #tpu.pipeline_mode<synchronous>, transform_indices = @transform_8, window_bounds = array<i64: 4, 64>}, {pipeline_mode = #tpu.pipeline_mode<synchronous>, transform_indices = @transform_9, window_bounds = array<i64: 4, 64>}, {pipeline_mode = #tpu.pipeline_mode<synchronous>, transform_indices = @transform_10, window_bounds = array<i64: 1, 64>}, {pipeline_mode = #tpu.pipeline_mode<synchronous>, transform_indices = @transform_11, window_bounds = array<i64: 32, 128>}, {pipeline_mode = #tpu.pipeline_mode<synchronous>, transform_indices = @transform_12, window_bounds = array<i64: 64, 32>}, {pipeline_mode = #tpu.pipeline_mode<synchronous>, transform_indices = @transform_13, window_bounds = array<i64: 1, 32>}, {pipeline_mode = #tpu.pipeline_mode<synchronous>, transform_indices = @transform_14, window_bounds = array<i64: 32, 128>}, {pipeline_mode = #tpu.pipeline_mode<synchronous>, transform_indices = @transform_15, window_bounds = array<i64: 1, 128>}, {transform_indices = @transform_16, window_bounds = array<i64: 1, 8, 128>}]} {
    %c0 = arith.constant 0 : index
    %c0_0 = arith.constant 0 : index
    %c0_1 = arith.constant 0 : index
    %0 = vector.load %arg2[%c0, %c0_0, %c0_1] : memref<1x8x32xf32, #tpu.memory_space<vmem>>, vector<1x8x32xf32>
    %1 = vector.shape_cast %0 : vector<1x8x32xf32> to vector<8x32xf32>
    %c0_2 = arith.constant 0 : index
    %c0_3 = arith.constant 0 : index
    %c0_4 = arith.constant 0 : index
    %2 = vector.load %arg3[%c0_2, %c0_3, %c0_4] : memref<1x8x32xf32, #tpu.memory_space<vmem>>, vector<1x8x32xf32>
    %3 = vector.shape_cast %2 : vector<1x8x32xf32> to vector<8x32xf32>
    %4 = arith.truncf %1 : vector<8x32xf32> to vector<8x32xbf16>
    %c0_5 = arith.constant 0 : index
    %c0_6 = arith.constant 0 : index
    %5 = vector.load %arg5[%c0_5, %c0_6] : memref<32x8xbf16, #tpu.memory_space<vmem>>, vector<32x8xbf16>
    %cst = arith.constant dense<0.000000e+00> : vector<8x8xf32>
    %6 = tpu.matmul %4, %5, %cst {dimension_numbers = #tpu.dot_dimension_numbers<[1], [0], [0], [1], [0, 0, 1, 1], [], []>} : vector<8x32xbf16>, vector<32x8xbf16>, vector<8x8xf32> -> vector<8x8xf32>
    %c0_7 = arith.constant 0 : index
    %c0_8 = arith.constant 0 : index
    %7 = vector.load %arg8[%c0_7, %c0_8] : memref<1x8xf32, #tpu.memory_space<vmem>>, vector<1x8xf32>
    %8 = vector.broadcast %7 : vector<1x8xf32> to vector<8x8xf32>
    %9 = arith.addf %6, %8 : vector<8x8xf32>
    %10 = vector.extract_strided_slice %9 {offsets = [0, 0], sizes = [8, 4], strides = [1, 1]} : vector<8x8xf32> to vector<8x4xf32>
    %11 = vector.extract_strided_slice %9 {offsets = [0, 4], sizes = [8, 4], strides = [1, 1]} : vector<8x8xf32> to vector<8x4xf32>
    %12 = arith.negf %11 : vector<8x4xf32>
    %13 = math.exp %12 : vector<8x4xf32>
    %cst_9 = arith.constant 1.000000e+00 : f32
    %14 = vector.broadcast %cst_9 : f32 to vector<8x4xf32>
    %15 = arith.addf %14, %13 : vector<8x4xf32>
    %16 = arith.divf %14, %15 : vector<8x4xf32>
    %17 = arith.mulf %10, %16 : vector<8x4xf32>
    %18 = arith.truncf %1 : vector<8x32xf32> to vector<8x32xbf16>
    %c0_10 = arith.constant 0 : index
    %c0_11 = arith.constant 0 : index
    %19 = vector.load %arg6[%c0_10, %c0_11] : memref<32x8xbf16, #tpu.memory_space<vmem>>, vector<32x8xbf16>
    %cst_12 = arith.constant dense<0.000000e+00> : vector<8x8xf32>
    %20 = tpu.matmul %18, %19, %cst_12 {dimension_numbers = #tpu.dot_dimension_numbers<[1], [0], [0], [1], [0, 0, 1, 1], [], []>} : vector<8x32xbf16>, vector<32x8xbf16>, vector<8x8xf32> -> vector<8x8xf32>
    %21 = arith.truncf %3 : vector<8x32xf32> to vector<8x32xbf16>
    %c0_13 = arith.constant 0 : index
    %c0_14 = arith.constant 0 : index
    %22 = vector.load %arg7[%c0_13, %c0_14] : memref<32x8xbf16, #tpu.memory_space<vmem>>, vector<32x8xbf16>
    %cst_15 = arith.constant dense<0.000000e+00> : vector<8x8xf32>
    %23 = tpu.matmul %21, %22, %cst_15 {dimension_numbers = #tpu.dot_dimension_numbers<[1], [0], [0], [1], [0, 0, 1, 1], [], []>} : vector<8x32xbf16>, vector<32x8xbf16>, vector<8x8xf32> -> vector<8x8xf32>
    %24 = arith.addf %20, %23 : vector<8x8xf32>
    %c0_16 = arith.constant 0 : index
    %c0_17 = arith.constant 0 : index
    %25 = vector.load %arg8[%c0_16, %c0_17] : memref<1x8xf32, #tpu.memory_space<vmem>>, vector<1x8xf32>
    %26 = vector.broadcast %25 : vector<1x8xf32> to vector<8x8xf32>
    %27 = arith.addf %24, %26 : vector<8x8xf32>
    %28 = vector.extract_strided_slice %27 {offsets = [0, 0], sizes = [8, 4], strides = [1, 1]} : vector<8x8xf32> to vector<8x4xf32>
    %29 = vector.extract_strided_slice %27 {offsets = [0, 4], sizes = [8, 4], strides = [1, 1]} : vector<8x8xf32> to vector<8x4xf32>
    %30 = arith.negf %29 : vector<8x4xf32>
    %31 = math.exp %30 : vector<8x4xf32>
    %cst_18 = arith.constant 1.000000e+00 : f32
    %32 = vector.broadcast %cst_18 : f32 to vector<8x4xf32>
    %33 = arith.addf %32, %31 : vector<8x4xf32>
    %34 = arith.divf %32, %33 : vector<8x4xf32>
    %35 = arith.mulf %28, %34 : vector<8x4xf32>
    %c1_i32 = arith.constant 1 : i32
    %36 = tpu.dynamic_rotate %35 by %c1_i32 dim 0 : vector<8x4xf32>, i32 -> vector<8x4xf32>
    %37 = tpu.iota {dimensions = array<i32: 0>} : vector<8x4xi32>
    %c0_i32 = arith.constant 0 : i32
    %38 = vector.broadcast %c0_i32 : i32 to vector<8x4xi32>
    %39 = arith.cmpi eq, %37, %38 : vector<8x4xi32>
    %c0_19 = arith.constant 0 : index
    %c0_20 = arith.constant 0 : index
    %c0_21 = arith.constant 0 : index
    %c0_22 = arith.constant 0 : index
    %40 = vector.load %arg4[%c0_19, %c0_20, %c0_21, %c0_22] : memref<1x1x1x4xf32, #tpu.memory_space<vmem>>, vector<1x1x1x4xf32>
    %41 = vector.shape_cast %40 : vector<1x1x1x4xf32> to vector<1x4xf32>
    %42 = vector.shape_cast %41 : vector<1x4xf32> to vector<1x4xf32>
    %43 = vector.broadcast %42 : vector<1x4xf32> to vector<8x4xf32>
    %44 = arith.select %39, %43, %36 : vector<8x4xi1>, vector<8x4xf32>
    %45 = arith.truncf %44 : vector<8x4xf32> to vector<8x4xbf16>
    %c0_23 = arith.constant 0 : index
    %c0_24 = arith.constant 0 : index
    %46 = vector.load %arg9[%c0_23, %c0_24] : memref<4x64xbf16, #tpu.memory_space<vmem>>, vector<4x64xbf16>
    %cst_25 = arith.constant dense<0.000000e+00> : vector<8x64xf32>
    %47 = tpu.matmul %45, %46, %cst_25 {dimension_numbers = #tpu.dot_dimension_numbers<[1], [0], [0], [1], [0, 0, 1, 1], [], []>} : vector<8x4xbf16>, vector<4x64xbf16>, vector<8x64xf32> -> vector<8x64xf32>
    %48 = arith.truncf %17 : vector<8x4xf32> to vector<8x4xbf16>
    %c0_26 = arith.constant 0 : index
    %c0_27 = arith.constant 0 : index
    %49 = vector.load %arg10[%c0_26, %c0_27] : memref<4x64xbf16, #tpu.memory_space<vmem>>, vector<4x64xbf16>
    %cst_28 = arith.constant dense<0.000000e+00> : vector<8x64xf32>
    %50 = tpu.matmul %48, %49, %cst_28 {dimension_numbers = #tpu.dot_dimension_numbers<[1], [0], [0], [1], [0, 0, 1, 1], [], []>} : vector<8x4xbf16>, vector<4x64xbf16>, vector<8x64xf32> -> vector<8x64xf32>
    %51 = arith.addf %47, %50 : vector<8x64xf32>
    %52 = arith.truncf %35 : vector<8x4xf32> to vector<8x4xbf16>
    %c0_29 = arith.constant 0 : index
    %c0_30 = arith.constant 0 : index
    %53 = vector.load %arg11[%c0_29, %c0_30] : memref<4x64xbf16, #tpu.memory_space<vmem>>, vector<4x64xbf16>
    %cst_31 = arith.constant dense<0.000000e+00> : vector<8x64xf32>
    %54 = tpu.matmul %52, %53, %cst_31 {dimension_numbers = #tpu.dot_dimension_numbers<[1], [0], [0], [1], [0, 0, 1, 1], [], []>} : vector<8x4xbf16>, vector<4x64xbf16>, vector<8x64xf32> -> vector<8x64xf32>
    %55 = arith.addf %51, %54 : vector<8x64xf32>
    %c0_32 = arith.constant 0 : index
    %c0_33 = arith.constant 0 : index
    %56 = vector.load %arg12[%c0_32, %c0_33] : memref<1x64xf32, #tpu.memory_space<vmem>>, vector<1x64xf32>
    %57 = vector.broadcast %56 : vector<1x64xf32> to vector<8x64xf32>
    %58 = arith.addf %55, %57 : vector<8x64xf32>
    %59 = vector.extract_strided_slice %58 {offsets = [0, 0], sizes = [8, 32], strides = [1, 1]} : vector<8x64xf32> to vector<8x32xf32>
    %60 = vector.extract_strided_slice %58 {offsets = [0, 32], sizes = [8, 32], strides = [1, 1]} : vector<8x64xf32> to vector<8x32xf32>
    %61 = arith.negf %60 : vector<8x32xf32>
    %62 = math.exp %61 : vector<8x32xf32>
    %cst_34 = arith.constant 1.000000e+00 : f32
    %63 = vector.broadcast %cst_34 : f32 to vector<8x32xf32>
    %64 = arith.addf %63, %62 : vector<8x32xf32>
    %65 = arith.divf %63, %64 : vector<8x32xf32>
    %66 = arith.mulf %59, %65 : vector<8x32xf32>
    %67 = arith.truncf %66 : vector<8x32xf32> to vector<8x32xbf16>
    %c0_35 = arith.constant 0 : index
    %c0_36 = arith.constant 0 : index
    %68 = vector.load %arg13[%c0_35, %c0_36] : memref<32x128xbf16, #tpu.memory_space<vmem>>, vector<32x128xbf16>
    %cst_37 = arith.constant dense<0.000000e+00> : vector<8x128xf32>
    %69 = tpu.matmul %67, %68, %cst_37 {dimension_numbers = #tpu.dot_dimension_numbers<[1], [0], [0], [1], [0, 0, 1, 1], [], []>} : vector<8x32xbf16>, vector<32x128xbf16>, vector<8x128xf32> -> vector<8x128xf32>
    %70 = vector.extract_strided_slice %69 {offsets = [0, 0], sizes = [8, 64], strides = [1, 1]} : vector<8x128xf32> to vector<8x64xf32>
    %71 = vector.extract_strided_slice %69 {offsets = [0, 64], sizes = [8, 64], strides = [1, 1]} : vector<8x128xf32> to vector<8x64xf32>
    %72 = arith.negf %70 : vector<8x64xf32>
    %73 = math.exp %72 : vector<8x64xf32>
    %cst_38 = arith.constant 1.000000e+00 : f32
    %74 = vector.broadcast %cst_38 : f32 to vector<8x64xf32>
    %75 = arith.addf %74, %73 : vector<8x64xf32>
    %76 = arith.divf %74, %75 : vector<8x64xf32>
    %77 = arith.mulf %70, %76 : vector<8x64xf32>
    %78 = arith.mulf %77, %71 : vector<8x64xf32>
    %79 = arith.truncf %78 : vector<8x64xf32> to vector<8x64xbf16>
    %c0_39 = arith.constant 0 : index
    %c0_40 = arith.constant 0 : index
    %80 = vector.load %arg14[%c0_39, %c0_40] : memref<64x32xbf16, #tpu.memory_space<vmem>>, vector<64x32xbf16>
    %cst_41 = arith.constant dense<0.000000e+00> : vector<8x32xf32>
    %81 = tpu.matmul %79, %80, %cst_41 {dimension_numbers = #tpu.dot_dimension_numbers<[1], [0], [0], [1], [0, 0, 1, 1], [], []>} : vector<8x64xbf16>, vector<64x32xbf16>, vector<8x32xf32> -> vector<8x32xf32>
    %82 = arith.mulf %81, %81 : vector<8x32xf32>
    %cst_42 = arith.constant dense<0.000000e+00> : vector<8xf32>
    %83 = vector.multi_reduction <add>, %82, %cst_42 [1] : vector<8x32xf32> to vector<8xf32>
    %84 = vector.shape_cast %83 : vector<8xf32> to vector<8x1xf32>
    %cst_43 = arith.constant 3.200000e+01 : f32
    %85 = vector.broadcast %cst_43 : f32 to vector<8x1xf32>
    %86 = arith.divf %84, %85 : vector<8x1xf32>
    %cst_44 = arith.constant 9.99999997E-7 : f32
    %87 = vector.broadcast %cst_44 : f32 to vector<8x1xf32>
    %88 = arith.addf %86, %87 : vector<8x1xf32>
    %89 = math.rsqrt %88 : vector<8x1xf32>
    %90 = vector.broadcast %89 : vector<8x1xf32> to vector<8x32xf32>
    %91 = arith.mulf %81, %90 : vector<8x32xf32>
    %c0_45 = arith.constant 0 : index
    %c0_46 = arith.constant 0 : index
    %92 = vector.load %arg15[%c0_45, %c0_46] : memref<1x32xf32, #tpu.memory_space<vmem>>, vector<1x32xf32>
    %93 = vector.broadcast %92 : vector<1x32xf32> to vector<8x32xf32>
    %94 = arith.mulf %91, %93 : vector<8x32xf32>
    %95 = arith.addf %66, %94 : vector<8x32xf32>
    %96 = arith.truncf %95 : vector<8x32xf32> to vector<8x32xbf16>
    %c0_47 = arith.constant 0 : index
    %c0_48 = arith.constant 0 : index
    %97 = vector.load %arg16[%c0_47, %c0_48] : memref<32x128xbf16, #tpu.memory_space<vmem>>, vector<32x128xbf16>
    %cst_49 = arith.constant dense<0.000000e+00> : vector<8x128xf32>
    %98 = tpu.matmul %96, %97, %cst_49 {dimension_numbers = #tpu.dot_dimension_numbers<[1], [0], [0], [1], [0, 0, 1, 1], [], []>} : vector<8x32xbf16>, vector<32x128xbf16>, vector<8x128xf32> -> vector<8x128xf32>
    %c0_50 = arith.constant 0 : index
    %c0_51 = arith.constant 0 : index
    %99 = vector.load %arg17[%c0_50, %c0_51] : memref<1x128xf32, #tpu.memory_space<vmem>>, vector<1x128xf32>
    %100 = vector.broadcast %99 : vector<1x128xf32> to vector<8x128xf32>
    %101 = arith.addf %98, %100 : vector<8x128xf32>
    %c0_52 = arith.constant 0 : index
    %c0_53 = arith.constant 0 : index
    %c0_54 = arith.constant 0 : index
    %102 = vector.load %arg18[%c0_52, %c0_53, %c0_54] : memref<1x8x128xf32, #tpu.memory_space<vmem>>, vector<1x8x128xf32>
    %103 = vector.shape_cast %102 : vector<1x8x128xf32> to vector<8x128xf32>
    %104 = vector.shape_cast %101 : vector<8x128xf32> to vector<1x8x128xf32>
    tpu.vector_store %arg18[%c0_52, %c0_53, %c0_54], %104 {strides = array<i32>} : memref<1x8x128xf32, #tpu.memory_space<vmem>>, vector<1x8x128xf32>,
    return
  }
  func.func @transform_0(%arg0: i32, %arg1: i32) -> (i32, i32, i32) {
    %c0_i32 = arith.constant 0 : i32
    %c0_i32_0 = arith.constant 0 : i32
    return %arg0, %arg1, %c0_i32 : i32, i32, i32
  }
  func.func @transform_1(%arg0: i32, %arg1: i32) -> (i32, i32, i32) {
    %c0_i32 = arith.constant 0 : i32
    %c0_i32_0 = arith.constant 0 : i32
    return %arg0, %arg1, %c0_i32 : i32, i32, i32
  }
  func.func @transform_2(%arg0: i32, %arg1: i32) -> (i32, i32, i32, i32) {
    %c0_i32 = arith.constant 0 : i32
    %c0_i32_0 = arith.constant 0 : i32
    %c0_i32_1 = arith.constant 0 : i32
    return %arg0, %arg1, %c0_i32, %c0_i32_0 : i32, i32, i32, i32
  }
  func.func @transform_3(%arg0: i32, %arg1: i32) -> (i32, i32) {
    %c0_i32 = arith.constant 0 : i32
    %c0_i32_0 = arith.constant 0 : i32
    %c0_i32_1 = arith.constant 0 : i32
    return %c0_i32, %c0_i32_0 : i32, i32
  }
  func.func @transform_4(%arg0: i32, %arg1: i32) -> (i32, i32) {
    %c0_i32 = arith.constant 0 : i32
    %c0_i32_0 = arith.constant 0 : i32
    %c0_i32_1 = arith.constant 0 : i32
    return %c0_i32, %c0_i32_0 : i32, i32
  }
  func.func @transform_5(%arg0: i32, %arg1: i32) -> (i32, i32) {
    %c0_i32 = arith.constant 0 : i32
    %c0_i32_0 = arith.constant 0 : i32
    %c0_i32_1 = arith.constant 0 : i32
    return %c0_i32, %c0_i32_0 : i32, i32
  }
  func.func @transform_6(%arg0: i32, %arg1: i32) -> (i32, i32) {
    %c0_i32 = arith.constant 0 : i32
    %c0_i32_0 = arith.constant 0 : i32
    %c0_i32_1 = arith.constant 0 : i32
    return %c0_i32, %c0_i32_0 : i32, i32
  }
  func.func @transform_7(%arg0: i32, %arg1: i32) -> (i32, i32) {
    %c0_i32 = arith.constant 0 : i32
    %c0_i32_0 = arith.constant 0 : i32
    %c0_i32_1 = arith.constant 0 : i32
    return %c0_i32, %c0_i32_0 : i32, i32
  }
  func.func @transform_8(%arg0: i32, %arg1: i32) -> (i32, i32) {
    %c0_i32 = arith.constant 0 : i32
    %c0_i32_0 = arith.constant 0 : i32
    %c0_i32_1 = arith.constant 0 : i32
    return %c0_i32, %c0_i32_0 : i32, i32
  }
  func.func @transform_9(%arg0: i32, %arg1: i32) -> (i32, i32) {
    %c0_i32 = arith.constant 0 : i32
    %c0_i32_0 = arith.constant 0 : i32
    %c0_i32_1 = arith.constant 0 : i32
    return %c0_i32, %c0_i32_0 : i32, i32
  }
  func.func @transform_10(%arg0: i32, %arg1: i32) -> (i32, i32) {
    %c0_i32 = arith.constant 0 : i32
    %c0_i32_0 = arith.constant 0 : i32
    %c0_i32_1 = arith.constant 0 : i32
    return %c0_i32, %c0_i32_0 : i32, i32
  }
  func.func @transform_11(%arg0: i32, %arg1: i32) -> (i32, i32) {
    %c0_i32 = arith.constant 0 : i32
    %c0_i32_0 = arith.constant 0 : i32
    %c0_i32_1 = arith.constant 0 : i32
    return %c0_i32, %c0_i32_0 : i32, i32
  }
  func.func @transform_12(%arg0: i32, %arg1: i32) -> (i32, i32) {
    %c0_i32 = arith.constant 0 : i32
    %c0_i32_0 = arith.constant 0 : i32
    %c0_i32_1 = arith.constant 0 : i32
    return %c0_i32, %c0_i32_0 : i32, i32
  }
  func.func @transform_13(%arg0: i32, %arg1: i32) -> (i32, i32) {
    %c0_i32 = arith.constant 0 : i32
    %c0_i32_0 = arith.constant 0 : i32
    %c0_i32_1 = arith.constant 0 : i32
    return %c0_i32, %c0_i32_0 : i32, i32
  }
  func.func @transform_14(%arg0: i32, %arg1: i32) -> (i32, i32) {
    %c0_i32 = arith.constant 0 : i32
    %c0_i32_0 = arith.constant 0 : i32
    %c0_i32_1 = arith.constant 0 : i32
    return %c0_i32, %c0_i32_0 : i32, i32
  }
  func.func @transform_15(%arg0: i32, %arg1: i32) -> (i32, i32) {
    %c0_i32 = arith.constant 0 : i32
    %c0_i32_0 = arith.constant 0 : i32
    %c0_i32_1 = arith.constant 0 : i32
    return %c0_i32, %c0_i32_0 : i32, i32
  }
  func.func @transform_16(%arg0: i32, %arg1: i32) -> (i32, i32, i32) {
    %c0_i32 = arith.constant 0 : i32
    %c0_i32_0 = arith.constant 0 : i32
    return %arg0, %arg1, %c0_i32 : i32, i32, i32
  }
}

</mosaic_0001>

<bundles_post_ra>
// kernel: asr_adapter_forward.1
= control target key start
LH: loop header
LB: loop body
LE: loop exit
PB: predicated region body
PF: predicated region fallthrough
CT: control target
= control target key end

     0   :  { %s1701_s21 = smov 0   ;;  %s1703_s22 = smov 0   ;;  %s1886_s0 = inlined_call_operand.vmem [shape: f32[2,25,32], index: 0, kind: input, shape index: {}]   ;;  %s1887_s1 = inlined_call_operand.vmem [shape: f32[2,24,32], index: 1, kind: input, shape index: {}]   ;;  %s1888_s2 = inlined_call_operand.vmem [shape: f32[2,3,1,4], index: 2, kind: input, shape index: {}]   ;;  %s1889_s3 = inlined_call_operand.vmem [shape: bf16[32,8], index: 3, kind: input, shape index: {}]   ;;  %s1890_s4 = inlined_call_operand.vmem [shape: bf16[32,8], index: 4, kind: input, shape index: {}]   ;;  %s1891_s5 = inlined_call_operand.vmem [shape: bf16[32,8], index: 5, kind: input, shape index: {}]   ;;  %s1892_s6 = inlined_call_operand.vmem [shape: f32[1,8], index: 6, kind: input, shape index: {}]   ;;  %s1893_s7 = inlined_call_operand.vmem [shape: bf16[4,64], index: 7, kind: input, shape index: {}]   ;;  %s1894_s8 = inlined_call_operand.vmem [shape: bf16[4,64], index: 8, kind: input, shape index: {}]   ;;  %s1895_s9 = inlined_call_operand.vmem [shape: bf16[4,64], index: 9, kind: input, shape index: {}]   ;;  %s1896_s10 = inlined_call_operand.vmem [shape: f32[1,64], index: 10, kind: input, shape index: {}]   ;;  %s1897_s11 = inlined_call_operand.vmem [shape: bf16[32,128], index: 11, kind: input, shape index: {}]   ;;  %s1898_s12 = inlined_call_operand.vmem [shape: bf16[64,32], index: 12, kind: input, shape index: {}]   ;;  %s1899_s13 = inlined_call_operand.vmem [shape: f32[1,32], index: 13, kind: input, shape index: {}]   ;;  %s1900_s14 = inlined_call_operand.vmem [shape: bf16[32,128], index: 14, kind: input, shape index: {}]   ;;  %s1901_s15 = inlined_call_operand.vmem [shape: f32[1,128], index: 15, kind: input, shape index: {}]   ;;  %s1902_s16 = inlined_call_operand.vmem [shape: f32[2,24,128], index: 16, kind: output, shape index: {}]  }
   0x1   :  { %1903 = sst [smem:[#allocation4_spill]] %s1886_s0  ;;  %s1705_s23 = smov 0  }
   0x2   :  { %1904 = sst [smem:[#allocation5_spill]] %s1889_s3  ;;  %s1707_s24 = smov 0  }
   0x3   :  { %1905 = sst [smem:[#allocation6_spill]] %s1891_s5  ;;  %s1709_s25 = smov 0  }
   0x4 LB: > { %s35_s26 = sadd.s32 1, %s1601_s23  ;;  %s38_s27 = sadd.s32 1, %s1605_s24  ;;  %s1609_s25 = sphi %s1709_s25, %s26_s25   ;;  %s1605_s24 = sphi %s1707_s24, %s1916_s24   ;;  %s1601_s23 = sphi %s1705_s23, %s1915_s23   ;;  %s1597_s22 = sphi %s1703_s22, %s1914_s22   ;;  %s1593_s21 = sphi %s1701_s21, %s1913_s21  }
   0x5   : > { %p36_p0 = scmp.ge.s32.totalorder %s35_s26, 3  ;;  %p1358_p1 = scmp.ge.s32.totalorder %s1609_s25, 1 }
   0x6   : > { %p510_p2 = scmp.lt.s32.totalorder %s1609_s25, 7 }
   0x7   : > { %s1918_s26 = smov (%p36_p0, %s35_s26), 0  ;;  %s1920_s27 = smov (!%p36_p0, %s38_s27), %s1605_s24 }
   0x8   : > { %1906 = sst [smem:[#allocation2_spill]] %s1918_s26  ;;  %p511_p3 = pnand %p1358_p1, %p510_p2 }
   0x9   : > { %p40_p4 = scmp.ge.s32.totalorder %s1920_s27, 2  ;;  %s1908_s3 = sld [smem:[#allocation5_spill]] (!%p511_p3) }
   0xa   : > { %514 = sbr.rel (%p511_p3) target bundleno = 1608 (0x648), region = 84  ;;  %s1909_s5 = sld [smem:[#allocation6_spill]] (!%p511_p3) }
   0xb   : > { %s1922_s27 = smov (%p40_p4, %s1920_s27), 0  ;;  %p581_p5 = scmp.lt.s32.totalorder (!%p511_p3), %s1597_s22, 1 }
   0xc   : > { %1907 = sst [smem:[#allocation3_spill]] %s1922_s27  ;;  %p583_p6 = scmp.lt.s32.totalorder (!%p511_p3), %s1593_s21, 3 }
   0xd   : > { %p591_p7 = scmp.lt.s32.totalorder (!%p511_p3), %s1593_s21, 2  ;;  %s1613_s20 = smov (!%p511_p3), 124  }
   0xf   : > { %v1539_v0 = vld [vmem:[%s1908_s3 + $0x8] sm:$0xff]   ;;  %v1611_v1 = vmov 0.0   ;;  %v1541_v3 = vld [vmem:[%s1908_s3] sm:$0xff]   ;;  %vm1612_vm0 = vmmov 0   ;;  %s1924_s22 = smov (!%p581_p5, %s1597_s22), 1  ;;  %vm639_vm1 = vcmask 261120   ;;  %v823_v44 = vlaneseq }
  0x10   : > { %1423 = vmatprep.subr.bf16.mxu0 %v1611_v1  ;;  %1431 = vmatprep.subr.bf16.mxu1 %v1611_v1  ;;  %v1540_v2 = vld [vmem:[%s1909_s5 + $0x8] sm:$0xff]   ;;  %v1542_v4 = vld [vmem:[%s1909_s5] sm:$0xff]   ;;  %s584_s28 = scalar_select %p583_p6, %s1593_s21, 3  ;;  %vm842_vm2 = vcmask 1041408   ;;  %vm838_vm3 = vcmask 31744   ;;  %vm1105_vm5 = vcmask 523264  }
  0x11   : > { %1424 = vmatpush3.bf16.msra.mxu0 %v1539_v0  ;;  %1427 = vmatprep.mubr.msk.bf16.mxu0 %vm1612_vm0, %v1611_v1  ;;  %s1359_s29 = sshll.u32 %s1924_s22, 2  ;;  %v1543_v5 = vld [vmem:[%s1890_s4 + $0x8] sm:$0xff]   ;;  %s1493_s19 = smul.u32 3, %s1924_s22  ;;  %v1544_v8 = vld [vmem:[%s1890_s4] sm:$0xff]   ;;  %v824_v45 = vshrl.u32 %v823_v44, 7 }
  0x12   : > { %1425 = vmatprep.subr.bf16.mxu0 %v1611_v1  ;;  %1432 = vmatpush3.bf16.msra.mxu1 %v1540_v2  ;;  %s586_s30 = sadd.s32 %s1359_s29, %s584_s28  ;;  %s1910_s5 = sld [smem:[#allocation4_spill]]  ;;  %v1363_v11 = vld [vmem:[%s1892_s6] ss:$0 sm:$0xff]  ;;  %v1545_v53 = vld [vmem:[%s1897_s11 + $0x8] sm:$0xff]  }
  0x13   : > { %1433 = vmatprep.subr.bf16.mxu1 %v1611_v1  ;;  %1435 = vmatprep.mubr.msk.bf16.mxu1 %vm1612_vm0, %v1611_v1  ;;  %s1360_s0 = sshll.u32 %s586_s30, 3  ;;  %s1926_s21 = smov (!%p591_p7, %s1593_s21), 2  ;;  %v837_v31 = vld [vmem:[%s1894_s8] sm:$0x3]  ;;  %vm825_vm4 = vcmp.eq.s32.totalorder %v824_v45, 0 }
  0x14   : > { %s1769_s26 = sadd.s32 %s1493_s19, %s1926_s21  ;;  %v844_v32 = vsel %vm842_vm2, %v837_v31, 0  ;;  %v835_v33 = vld [vmem:[%s1893_s7] sm:$0x3] }
  0x15   : > { %1426 = vmatpush3.bf16.msra.mxu0 %v1541_v3  ;;  %s1361_s28 = sshll.u32 %s1769_s26, 3  ;;  %v890_v34 = vsel %vm842_vm2, %v835_v33, 0  ;;  %v933_v40 = vld [vmem:[%s1895_s9] sm:$0x3]  ;;  %s603_s18 = scalar_lea.vmem %s1888_s2, %s1769_s26 }
  0x16   : > { %1434 = vmatpush3.bf16.msra.mxu1 %v1542_v4  ;;  %1439 = vmatprep.subr.bf16.mxu0 %v1611_v1  ;;  %s596_s30 = scalar_lea.vmem %s1887_s1, %s1361_s28  ;;  %v938_v43 = vsel %vm842_vm2, %v933_v40, 0  ;;  %v1375_v48 = vld [vmem:[%s603_s18] ss:$0 sm:$0xff]  ;;  %s611_s21 = scalar_lea.vmem %s1902_s16, %s1361_s28 }
  0x17   : > { %1447 = vmatprep.subr.bf16.mxu1 %v1611_v1  ;;  %v614_v9 = vld [vmem:[%s596_s30] sm:$0xff] }
  0x18   : > { %s588_s27 = scalar_lea.vmem %s1910_s5, %s1360_s0  ;;  %v698_v10 = vpack.c.bf16 %v614_v9, %v614_v9  ;;  %v1379_v63 = vld [vmem:[%s1896_s10] ss:$0 sm:$0xff] }
  0x19   : > { %v613_v6 = vld [vmem:[%s588_s27] sm:$0xff]  ;;  %s1615_s27 = smov 64  }
  0x1a   : > { %v615_v7 = vpack.c.bf16 %v613_v6, %v613_v6  ;;  %1436 = vmatmul.mubr.msk.bf16.vlgmr.msra.gmra.mxu1 %vm639_vm1, %v698_v10  ;;  %v1546_v10 = vld [vmem:[%s1897_s11] sm:$0xff]  }
  0x1b   : > { %1449 = vmatprep.mubr.msk.bf16.mxu1 %vm1612_vm0, %v1611_v1  ;;  %1448 = vmatpush3.bf16.msra.mxu1 %v844_v32 }
  0x1c   : > { %1428 = vmatmul.mubr.msk.bf16.vlgmr.msra.gmra.mxu0 %vm639_vm1, %v615_v7  ;;  %1459 = vmatprep.subr.bf16.mxu1 %v1611_v1 }
  0x1d   : > { %1440 = vmatpush3.bf16.msra.mxu0 %v1543_v5  ;;  %1443 = vmatprep.mubr.msk.bf16.mxu0 %vm1612_vm0, %v1611_v1 }
  0x1e   : > { %1441 = vmatprep.subr.bf16.mxu0 %v1611_v1 }
  0x21   : > { %1442 = vmatpush3.bf16.msra.mxu0 %v1544_v8 }
  0x22   : > { %1453 = vmatprep.subr.bf16.mxu0 %v1611_v1 }
  0x24   : > { %1444 = vmatmul.mubr.msk.bf16.vlgmr.msra.gmra.mxu0 %vm639_vm1, %v615_v7 }
  0x25   : > { %1455 = vmatprep.mubr.msk.bf16.mxu0 %vm1612_vm0, %v1611_v1  ;;  %1454 = vmatpush3.bf16.msra.mxu0 %v890_v34 }
  0x26   : > { %1465 = vmatprep.subr.bf16.mxu0 %v1611_v1 }
  0xda   : > { %v752_v17 = vpop.f32.mrf.mxu1 }
  0xdc   : > { %v677_v12 = vpop.f32.mrf.mxu0  ;;  %v1437_v19 = vpop.f32.mrf.mxu1 }
  0xdd   : > { %v678_v13 = vadd.f32 %v1363_v11, %v677_v12 }
  0xde   : > { %v1429_v14 = vpop.f32.mrf.mxu0  ;;  %v755_v21 = vpop.f32.mrf.mxu1 }
  0xdf   : > { %v1367_v15 = vmul.f32 -1.442695, %v678_v13 }
  0xe0   : > { %v680_v16 = vpop.f32.mrf.mxu0  ;;  %v1438_v24 = vpop.f32.mrf.mxu1 }
  0xe1   : > { %1553 = vpow2.f32 %v1367_v15  ;;  %v1547_v15 = vld [vmem:[%s1898_s12 + $0x18] sm:$0xff]   ;;  %v1548_v16 = vld [vmem:[%s1898_s12 + $0x10] sm:$0xff]  }
  0xe2   : > { %v1430_v18 = vpop.f32.mrf.mxu0 }
  0xe3   : > { %v1550_v18 = vld [vmem:[%s1898_s12] sm:$0xff]  }
  0xe4   : > { %v804_v20 = vpop.f32.mrf.mxu0 }
  0xe5   : > { %v805_v22 = vadd.f32 %v804_v20, %v752_v17  ;;  %v1549_v17 = vld [vmem:[%s1898_s12 + $0x8] sm:$0xff]  }
  0xe6   : > { %v1445_v23 = vpop.f32.mrf.mxu0 }
  0xe7   : > { %v810_v25 = vadd.f32 %v1363_v11, %v805_v22 }
  0xe8   : > { %v807_v26 = vpop.f32.mrf.mxu0 }
  0xe9   : > { %v1374_v27 = vmul.f32 -1.442695, %v810_v25 }
  0xea   : > { %v1446_v28 = vpop.f32.mrf.mxu0 }
  0xeb   : > { %1555 = vpow2.f32 %v1374_v27 }
  0xee   : > { %v1554_v29 = vpop.eup %1553 }
  0xef   : > { %v686_v30 = vadd.f32 1.0, %v1554_v29 }
  0xf1   : > { %1557 = vrcp.f32 %v686_v30 }
  0xf8   : > { %v1556_v35 = vpop.eup %1555 }
  0xf9   : > { %v814_v36 = vadd.f32 1.0, %v1556_v35 }
  0xfb   : > { %1559 = vrcp.f32 %v814_v36 }
  0xfe   : > { %v1558_v37 = vpop.eup %1557 }
  0xff   : > { %690 = vrot.lane.b32.xlu0 %v1558_v37, %s1613_s20  ;;  %v1551_v37 = vld [vmem:[%s1900_s14 + $0x8] sm:$0xff]  }
 0x108   : > { %v1560_v38 = vpop.eup %1559 }
 0x109   : > { %818 = vrot.lane.b32.xlu0 %v1560_v38, %s1613_s20  ;;  %s1614_s20 = smov 96   ;;  %v1552_v38 = vld [vmem:[%s1900_s14] sm:$0xff]  }
 0x171   : > { %v691_v39 = vpop.permute.xlu0 %690 }
 0x172   : > { %v693_v41 = vmul.f32 %v691_v39, %v678_v13 }
 0x174   : > { %v836_v42 = vpack.c.bf16 %v693_v41, %v693_v41 }
 0x176   : > { %1450 = vmatmul.mubr.msk.bf16.vlgmr.msra.gmra.mxu1 %vm838_vm3, %v836_v42 }
 0x177   : > { %1460 = vmatpush3.bf16.msra.mxu1 %v938_v43  ;;  %1461 = vmatprep.mubr.msk.bf16.mxu1 %vm1612_vm0, %v1611_v1  ;;  %v1390_v43 = vld [vmem:[%s1899_s13] ss:$0 sm:$0xff] }
 0x178   : > { %1473 = vmatprep.subr.bf16.mxu1 %v1611_v1 }
 0x17b   : > { %v819_v46 = vpop.permute.xlu0 %818 }
 0x17c   : > { %v821_v47 = vmul.f32 %v819_v46, %v810_v25 }
 0x17e   : > { %v822_v49 = vrot.slane %v821_v47, 7  ;;  %v932_v50 = vpack.c.bf16 %v821_v47, %v821_v47 }
 0x180   : > { %v833_v51 = vsel %vm825_vm4, %v1375_v48, %v822_v49  ;;  %1462 = vmatmul.mubr.msk.bf16.vlgmr.msra.gmra.mxu1 %vm838_vm3, %v932_v50 }
 0x181   : > { %v834_v52 = vpack.c.bf16 %v833_v51, %v833_v51  ;;  %1481 = vmatprep.mubr.msk.bf16.mxu1 %vm1612_vm0, %v1611_v1  ;;  %1474 = vmatpush3.bf16.msra.mxu1 %v1547_v15 }
 0x182   : > { %1475 = vmatprep.subr.bf16.mxu1 %v1611_v1 }
 0x183   : > { %1456 = vmatmul.mubr.msk.bf16.vlgmr.msra.gmra.mxu0 %vm838_vm3, %v834_v52 }
 0x184   : > { %1469 = vmatprep.mubr.msk.bf16.mxu0 %vm1612_vm0, %v1611_v1  ;;  %1466 = vmatpush3.bf16.msra.mxu0 %v1545_v53 }
 0x185   : > { %1467 = vmatprep.subr.bf16.mxu0 %v1611_v1  ;;  %1476 = vmatpush3.bf16.msra.mxu1 %v1548_v16 }
 0x186   : > { %1477 = vmatprep.subr.bf16.mxu1 %v1611_v1 }
 0x188   : > { %1468 = vmatpush3.bf16.msra.mxu0 %v1546_v10 }
 0x189   : > { %1485 = vmatprep.subr.bf16.mxu0 %v1611_v1  ;;  %1478 = vmatpush3.bf16.msra.mxu1 %v1549_v17 }
 0x18a   : > { %1479 = vmatprep.subr.bf16.mxu1 %v1611_v1 }
 0x18d   : > { %1480 = vmatpush3.bf16.msra.mxu1 %v1550_v18 }
 0x236   : > { %v880_v54 = vpop.f32.mrf.mxu1 }
 0x238   : > { %v1451_v55 = vpop.f32.mrf.mxu1 }
 0x23a   : > { %v883_v56 = vpop.f32.mrf.mxu1 }
 0x23c   : > { %v1452_v57 = vpop.f32.mrf.mxu1 }
 0x240   : > { %v974_v58 = vpop.f32.mrf.mxu1 }
 0x242   : > { %v1463_v59 = vpop.f32.mrf.mxu1 }
 0x243   : > { %v926_v60 = vpop.f32.mrf.mxu0 }
 0x244   : > { %v927_v61 = vadd.f32 %v926_v60, %v880_v54  ;;  %v977_v62 = vpop.f32.mrf.mxu1 }
 0x245   : > { %v1457_v0 = vpop.f32.mrf.mxu0 }
 0x246   : > { %v980_v2 = vadd.f32 %v974_v58, %v927_v61  ;;  %v1464_v3 = vpop.f32.mrf.mxu1 }
 0x247   : > { %v929_v4 = vpop.f32.mrf.mxu0 }
 0x248   : > { %v988_v5 = vadd.f32 %v1379_v63, %v980_v2 }
 0x249   : > { %v1458_v6 = vpop.f32.mrf.mxu0 }
 0x24a   : > { %v1380_v7 = vmul.f32 -1.442695, %v988_v5 }
 0x24c   : > { %1561 = vpow2.f32 %v1380_v7 }
 0x259   : > { %v1562_v8 = vpop.eup %1561 }
 0x25a   : > { %v992_v9 = vadd.f32 1.0, %v1562_v8 }
 0x25c   : > { %1563 = vrcp.f32 %v992_v9 }
 0x269   : > { %v1564_v11 = vpop.eup %1563 }
 0x26a   : > { %996 = vrot.lane.b32.xlu1 %v1564_v11, %s1614_s20 }
 0x2dc   : > { %v997_v12 = vpop.permute.xlu1 %996 }
 0x2dd   : > { %v999_v13 = vmul.f32 %v997_v12, %v988_v5 }
 0x2df   : > { %v1000_v14 = vpack.c.bf16 %v999_v13, %v999_v13 }
 0x2e1   : > { %1470 = vmatmul.mubr.msk.bf16.vlgmr.msra.gmra.mxu0 %vm639_vm1, %v1000_v14 }
 0x2e2   : > { %1489 = vmatprep.mubr.msk.bf16.mxu0 %vm1612_vm0, %v1611_v1  ;;  %1486 = vmatpush3.bf16.msra.mxu0 %v1551_v37 }
 0x2e3   : > { %1487 = vmatprep.subr.bf16.mxu0 %v1611_v1  ;;  %v1391_v1 = vld [vmem:[%s1901_s15] ss:$0 sm:$0xff] }
 0x2e6   : > { %1488 = vmatpush3.bf16.msra.mxu0 %v1552_v38 }
 0x3a1   : > { %v1054_v19 = vpop.f32.mrf.mxu0 }
 0x3a2   : > { %1068 = vrot.lane.b32.xlu1 %v1054_v19, %s1615_s27  ;;  %v1384_v23 = vmul.f32 -1.442695, %v1054_v19 }
 0x3a3   : > { %v1471_v20 = vpop.f32.mrf.mxu0 }
 0x3a4   : > { %1565 = vpow2.f32 %v1384_v23 }
 0x3a5   : > { %v1057_v21 = vpop.f32.mrf.mxu0 }
 0x3a7   : > { %v1472_v22 = vpop.f32.mrf.mxu0 }
 0x3b1   : > { %v1566_v24 = vpop.eup %1565 }
 0x3b2   : > { %v1063_v25 = vadd.f32 1.0, %v1566_v24 }
 0x3b4   : > { %1567 = vrcp.f32 %v1063_v25 }
 0x3c1   : > { %v1568_v26 = vpop.eup %1567 }
 0x3c2   : > { %v1066_v27 = vmul.f32 %v1568_v26, %v1054_v19 }
 0x414   : > { %v1069_v28 = vpop.permute.xlu1 %1068 }
 0x415   : > { %v1071_v29 = vmul.f32 %v1069_v28, %v1066_v27 }
 0x417   : > { %v1072_v30 = vpack.c.bf16 %v1071_v29, %v1071_v29 }
 0x419   : > { %1482 = vmatmul.mubr.msk.bf16.vlgmr.msra.gmra.mxu1 %vm1105_vm5, %v1072_v30 }
 0x4d9   : > { %v1143_v31 = vpop.f32.mrf.mxu1 }
 0x4da   : > { %v1149_v32 = vmul.f32 %v1143_v31, %v1143_v31 }
 0x4db   : > { %v1483_v33 = vpop.f32.mrf.mxu1 }
 0x4dc   : > { %v1150_v34 = vsel %vm639_vm1, %v1149_v32, 0.0 }
 0x4dd   : > { %1151 = vadd.xlane.f32.xlu0 %v1150_v34  ;;  %v1146_v35 = vpop.f32.mrf.mxu1 }
 0x4df   : > { %v1484_v36 = vpop.f32.mrf.mxu1 }
 0x566   : > { %v1152_v39 = vpop.xlane.xlu0 %1151 }
 0x567   : > { %v1154_v40 = vmul.f32 0.03125, %v1152_v39 }
 0x569   : > { %v1155_v41 = vadd.f32 1e-06, %v1154_v40 }
 0x56b   : > { %1569 = vrsqrt.f32 %v1155_v41 }
 0x578   : > { %v1570_v42 = vpop.eup %1569 }
 0x579   : > { %v1157_v44 = vmul.f32 %v1570_v42, %v1143_v31 }
 0x57b   : > { %v1165_v45 = vmul.f32 %v1390_v43, %v1157_v44 }
 0x57d   : > { %v1166_v46 = vadd.f32 %v1165_v45, %v999_v13 }
 0x57f   : > { %v1167_v47 = vpack.c.bf16 %v1166_v46, %v1166_v46 }
 0x581   : > { %1490 = vmatmul.mubr.msk.bf16.vlgmr.msra.gmra.mxu0 %vm639_vm1, %v1167_v47 }
 0x641   : > { %v1228_v48 = vpop.f32.mrf.mxu0 }
 0x642   : > { %v1229_v49 = vadd.f32 %v1391_v1, %v1228_v48 }
 0x643   : > { %v1491_v50 = vpop.f32.mrf.mxu0 }
 0x644   : > { %1234 = vst [vmem:[%s611_s21] sm:$0xff] %v1229_v49 }
 0x645   : > { %v1231_v51 = vpop.f32.mrf.mxu0 }
 0x647   : > { %v1492_v52 = vpop.f32.mrf.mxu0 }
 0x648 PF: > { %s26_s25 = sadd.s32 1, %s1609_s25   ;;  %s1911_s27 = sld [smem:[#allocation2_spill]] }
 0x649   : > { %p23_p8 = scmp.ge.s32.totalorder %s26_s25, 8   ;;  %s1912_s0 = sld [smem:[#allocation3_spill]] }
 0x64a   : > { %s1913_s21 = smov %s1601_s23  ;;  %s1914_s22 = smov %s1605_s24 }
 0x64b   :  { %25 = sbr.rel (!%p23_p8) target bundleno = 4 (0x4), region = 120 }
 0x64e   : > { %s1915_s23 = smov %s1911_s27 }
 0x64f   : > { %s1916_s24 = smov %s1912_s0 }

</bundles_post_ra>
